<compile_context>
chip_gen: v5e
topology: v5e:2x2
jax: 0.10.0
libtpu: 0.0.40
codegen_flags: <defaults>
</compile_context>

<pallas_src>
import jax
import jax.numpy as jnp
from jax import lax
from jax.experimental import pallas as pl
from jax.experimental.pallas import tpu as pltpu


def _round_up(x: int, m: int) -> int:
    return ((x + m - 1) // m) * m


# ---------------------------------------------------------------------------
# Fused kernel: per grid step (j = out-tile, i = row-tile of x)
#   when i == 0:  W_eff[j] = W[j] + out_proj(in_proj(W[j]))   (cached in VMEM)
#   always:       y[i, j]  = x[i] @ W_eff[j]^T + b[j]
# ---------------------------------------------------------------------------
def _gift_fused_kernel(x_ref, w_ref, b_ref, pin_w_ref, pin_b_ref,
                       pout_w_ref, pout_b_ref, y_ref, weff_ref):
    @pl.when(pl.program_id(1) == 0)
    def _():
        w = w_ref[...]
        # in_projection: (tile_out, in_f) x (rank, in_f) contracted on dim 1
        compressed = lax.dot_general(
            w, pin_w_ref[...],
            dimension_numbers=(((1,), (1,)), ((), ())),
            preferred_element_type=jnp.float32) + pin_b_ref[...]
        # TODO(synk): Hypernet block (config.gift_parameters['block_type']) source
        # is not part of the provided module; treated as identity here.
        # out_projection: (tile_out, rank) x (in_f, rank) contracted on dim 1
        delta = lax.dot_general(
            compressed, pout_w_ref[...].astype(jnp.float32),
            dimension_numbers=(((1,), (1,)), ((), ())),
            preferred_element_type=jnp.float32) + pout_b_ref[...]
        weff_ref[...] = (w.astype(jnp.float32) + delta).astype(weff_ref.dtype)

    # y = x @ W_eff^T + b   (contract on dim 1 of both -> no transpose)
    y = lax.dot_general(
        x_ref[...], weff_ref[...],
        dimension_numbers=(((1,), (1,)), ((), ())),
        preferred_element_type=jnp.float32) + b_ref[...]
    y_ref[...] = y.astype(y_ref.dtype)


# ---------------------------------------------------------------------------
# GIFTWrapper.forward equivalent for a single hooked GIFTLinear target module.
# (The PyTorch module-replacement / forward-pre-hook machinery is pure graph
# surgery; the computation is that of the single replaced linear layer.)
#   x:      (batch, seq, in_f)
#   w, b:   frozen GIFTLinear.weight (out_f, in_f) / bias (out_f,)
#   pin_*:  in_projection  Linear(in_f, rank)
#   pout_*: out_projection Linear(rank, in_f)   (zero-init in the reference)
# ---------------------------------------------------------------------------
def gift_wrapper_forward(x, w, b, pin_w, pin_b, pout_w, pout_b,
                         *, tile_n=256, tile_out=256):
    bsz, seq, in_f = x.shape
    out_f = w.shape[0]
    rank = pin_w.shape[0]
    n = bsz * seq
    x2d = x.reshape(n, in_f)

    # nn.Linear-style 1D biases -> (1, dim) rows for lane-friendly broadcast.
    b2d = b.reshape(1, out_f)
    pin_b2d = pin_b.reshape(1, rank)
    pout_b2d = pout_b.reshape(1, in_f)

    tile_n = min(tile_n, _round_up(n, 8))
    tile_out = min(tile_out, _round_up(out_f, 8))

    n_pad = _round_up(n, tile_n)
    out_pad = _round_up(out_f, tile_out)

    x_p = jnp.pad(x2d, ((0, n_pad - n), (0, 0))) if n_pad != n else x2d
    w_p = jnp.pad(w, ((0, out_pad - out_f), (0, 0))) if out_pad != out_f else w
    b_p = (jnp.pad(b2d, ((0, 0), (0, out_pad - out_f)))
           if out_pad != out_f else b2d)

    grid = (out_pad // tile_out, n_pad // tile_n)

    y = pl.pallas_call(
        _gift_fused_kernel,
        out_shape=jax.ShapeDtypeStruct((n_pad, out_pad), x.dtype),
        grid=grid,
        in_specs=[
            pl.BlockSpec((tile_n, in_f), lambda j, i: (i, 0)),      # x rows
            pl.BlockSpec((tile_out, in_f), lambda j, i: (j, 0)),    # W rows
            pl.BlockSpec((1, tile_out), lambda j, i: (0, j)),       # bias
            pl.BlockSpec((rank, in_f), lambda j, i: (0, 0)),        # in_proj.weight
            pl.BlockSpec((1, rank), lambda j, i: (0, 0)),           # in_proj.bias
            pl.BlockSpec((in_f, rank), lambda j, i: (0, 0)),        # out_proj.weight
            pl.BlockSpec((1, in_f), lambda j, i: (0, 0)),           # out_proj.bias
        ],
        out_specs=pl.BlockSpec((tile_n, tile_out), lambda j, i: (i, j)),
        scratch_shapes=[pltpu.VMEM((tile_out, in_f), x.dtype)],     # cached W_eff tile
        compiler_params=pltpu.CompilerParams(
            dimension_semantics=("parallel", "arbitrary"),
            vmem_limit_bytes=64 * 1024 * 1024),
    )(x_p, w_p, b_p, pin_w, pin_b2d, pout_w, pout_b2d)

    y = y[:n, :out_f] if (n_pad != n or out_pad != out_f) else y
    return y.reshape(bsz, seq, out_f)


def _reference(x, w, b, pin_w, pin_b, pout_w, pout_b):
    """Pure-JAX reference of GIFTLinear.forward with the hook-supplied delta."""
    compressed = w @ pin_w.T + pin_b
    delta = compressed @ pout_w.T + pout_b
    bsz, seq, in_f = x.shape
    x2d = x.reshape(-1, in_f)
    result = x2d @ w.T + b          # F.linear(x, W, b)
    result = result + x2d @ delta.T  # + F.linear(x, delta_weight)
    return result.reshape(bsz, seq, w.shape[0])


if __name__ == "__main__":
    key = jax.random.PRNGKey(0)
    B, S = 2, 8
    in_features, out_features, rank = 32, 32, 8

    k = jax.random.split(key, 7)
    x = jax.random.normal(k[0], (B, S, in_features), jnp.float32)
    # Frozen backbone linear (GIFTLinear.weight / bias)
    W = jax.random.normal(k[1], (out_features, in_features), jnp.float32) * 0.05
    b = jax.random.normal(k[2], (out_features,), jnp.float32) * 0.05
    # in_projection: Linear(in_features, rank, bias=True)
    pin_w = jax.random.normal(k[3], (rank, in_features), jnp.float32) * 0.05
    pin_b = jax.random.normal(k[4], (rank,), jnp.float32) * 0.05
    # out_projection: Linear(rank, in_features, bias=True)
    # NOTE: the reference __init__ zero-inits this projection; small non-zero
    # values are used here so the residual (delta_weight) path is exercised.
    pout_w = jax.random.normal(k[5], (in_features, rank), jnp.float32) * 0.05
    pout_b = jax.random.normal(k[6], (in_features,), jnp.float32) * 0.05

    ref = _reference(x, W, b, pin_w, pin_b, pout_w, pout_b)

    # Default tiles (single grid step at these small shapes).
    y = gift_wrapper_forward(x, W, b, pin_w, pin_b, pout_w, pout_b)
    y = jax.block_until_ready(y)
    assert y.shape == (B, S, out_features) and y.dtype == jnp.float32
    assert jnp.allclose(y, ref, atol=1e-4, rtol=1e-4), "mismatch vs reference"

    # Small explicit tiles -> 2x2 grid, exercises the W_eff scratch-caching path.
    y2 = gift_wrapper_forward(x, W, b, pin_w, pin_b, pout_w, pout_b,
                              tile_n=8, tile_out=16)
    y2 = jax.block_until_ready(y2)
    assert jnp.allclose(y2, ref, atol=1e-4, rtol=1e-4), "mismatch vs reference (tiled)"

    print("KERNEL_OK")
</pallas_src>

<mosaic_0001>
module attributes {stable_mosaic.version = 11 : i64} {
  func.func @_gift_fused_kernel(%arg0: i32, %arg1: i32, %arg2: memref<16x32xf32, #tpu.memory_space<vmem>>, %arg3: memref<32x32xf32, #tpu.memory_space<vmem>>, %arg4: memref<1x32xf32, #tpu.memory_space<vmem>>, %arg5: memref<8x32xf32, #tpu.memory_space<vmem>>, %arg6: memref<1x8xf32, #tpu.memory_space<vmem>>, %arg7: memref<32x8xf32, #tpu.memory_space<vmem>>, %arg8: memref<1x32xf32, #tpu.memory_space<vmem>>, %arg9: memref<16x32xf32, #tpu.memory_space<vmem>>, %arg10: memref<32x32xf32, #tpu.memory_space<vmem>>) attributes {dimension_semantics = [#tpu.dimension_semantics<parallel>, #tpu.dimension_semantics<arbitrary>], iteration_bounds = array<i64: 1, 1>, scalar_prefetch = 0 : i64, scratch_operands = 1 : i64, tpu.core_type = #tpu.core_type<tc>, window_params = [{transform_indices = @transform_0, window_bounds = array<i64: 16, 32>}, {transform_indices = @transform_1, window_bounds = array<i64: 32, 32>}, {transform_indices = @transform_2, window_bounds = array<i64: 1, 32>}, {pipeline_mode = #tpu.pipeline_mode<synchronous>, transform_indices = @transform_3, window_bounds = array<i64: 8, 32>}, {pipeline_mode = #tpu.pipeline_mode<synchronous>, transform_indices = @transform_4, window_bounds = array<i64: 1, 8>}, {pipeline_mode = #tpu.pipeline_mode<synchronous>, transform_indices = @transform_5, window_bounds = array<i64: 32, 8>}, {pipeline_mode = #tpu.pipeline_mode<synchronous>, transform_indices = @transform_6, window_bounds = array<i64: 1, 32>}, {transform_indices = @transform_7, window_bounds = array<i64: 16, 32>}]} {
    %c0_i32 = arith.constant 0 : i32
    %0 = arith.cmpi eq, %arg1, %c0_i32 : i32
    %1 = arith.extui %0 : i1 to i32
    %c0_i32_0 = arith.constant 0 : i32
    %2 = arith.cmpi ne, %1, %c0_i32_0 : i32
    scf.if %2 {
      %c0_8 = arith.constant 0 : index
      %c0_9 = arith.constant 0 : index
      %10 = vector.load %arg3[%c0_8, %c0_9] : memref<32x32xf32, #tpu.memory_space<vmem>>, vector<32x32xf32>
      %c0_10 = arith.constant 0 : index
      %c0_11 = arith.constant 0 : index
      %11 = vector.load %arg5[%c0_10, %c0_11] : memref<8x32xf32, #tpu.memory_space<vmem>>, vector<8x32xf32>
      %cst_12 = arith.constant dense<0.000000e+00> : vector<32x8xf32>
      %12 = tpu.matmul %10, %11, %cst_12 {dimension_numbers = #tpu.dot_dimension_numbers<[1], [1], [0], [0], [0, 0, 1, 0], [], []>} : vector<32x32xf32>, vector<8x32xf32>, vector<32x8xf32> -> vector<32x8xf32>
      %c0_13 = arith.constant 0 : index
      %c0_14 = arith.constant 0 : index
      %13 = vector.load %arg6[%c0_13, %c0_14] : memref<1x8xf32, #tpu.memory_space<vmem>>, vector<1x8xf32>
      %14 = vector.broadcast %13 : vector<1x8xf32> to vector<32x8xf32>
      %15 = arith.addf %12, %14 : vector<32x8xf32>
      %c0_15 = arith.constant 0 : index
      %c0_16 = arith.constant 0 : index
      %16 = vector.load %arg7[%c0_15, %c0_16] : memref<32x8xf32, #tpu.memory_space<vmem>>, vector<32x8xf32>
      %cst_17 = arith.constant dense<0.000000e+00> : vector<32x32xf32>
      %17 = tpu.matmul %15, %16, %cst_17 {dimension_numbers = #tpu.dot_dimension_numbers<[1], [1], [0], [0], [0, 0, 1, 0], [], []>} : vector<32x8xf32>, vector<32x8xf32>, vector<32x32xf32> -> vector<32x32xf32>
      %c0_18 = arith.constant 0 : index
      %c0_19 = arith.constant 0 : index
      %18 = vector.load %arg8[%c0_18, %c0_19] : memref<1x32xf32, #tpu.memory_space<vmem>>, vector<1x32xf32>
      %19 = vector.broadcast %18 : vector<1x32xf32> to vector<32x32xf32>
      %20 = arith.addf %17, %19 : vector<32x32xf32>
      %21 = arith.addf %10, %20 : vector<32x32xf32>
      %c0_20 = arith.constant 0 : index
      %c0_21 = arith.constant 0 : index
      %22 = vector.load %arg10[%c0_20, %c0_21] : memref<32x32xf32, #tpu.memory_space<vmem>>, vector<32x32xf32>
      tpu.vector_store %arg10[%c0_20, %c0_21], %21 {strides = array<i32>} : memref<32x32xf32, #tpu.memory_space<vmem>>, vector<32x32xf32>,
    } else {
    }
    %c0 = arith.constant 0 : index
    %c0_1 = arith.constant 0 : index
    %3 = vector.load %arg2[%c0, %c0_1] : memref<16x32xf32, #tpu.memory_space<vmem>>, vector<16x32xf32>
    %c0_2 = arith.constant 0 : index
    %c0_3 = arith.constant 0 : index
    %4 = vector.load %arg10[%c0_2, %c0_3] : memref<32x32xf32, #tpu.memory_space<vmem>>, vector<32x32xf32>
    %cst = arith.constant dense<0.000000e+00> : vector<16x32xf32>
    %5 = tpu.matmul %3, %4, %cst {dimension_numbers = #tpu.dot_dimension_numbers<[1], [1], [0], [0], [0, 0, 1, 0], [], []>} : vector<16x32xf32>, vector<32x32xf32>, vector<16x32xf32> -> vector<16x32xf32>
    %c0_4 = arith.constant 0 : index
    %c0_5 = arith.constant 0 : index
    %6 = vector.load %arg4[%c0_4, %c0_5] : memref<1x32xf32, #tpu.memory_space<vmem>>, vector<1x32xf32>
    %7 = vector.broadcast %6 : vector<1x32xf32> to vector<16x32xf32>
    %8 = arith.addf %5, %7 : vector<16x32xf32>
    %c0_6 = arith.constant 0 : index
    %c0_7 = arith.constant 0 : index
    %9 = vector.load %arg9[%c0_6, %c0_7] : memref<16x32xf32, #tpu.memory_space<vmem>>, vector<16x32xf32>
    tpu.vector_store %arg9[%c0_6, %c0_7], %8 {strides = array<i32>} : memref<16x32xf32, #tpu.memory_space<vmem>>, vector<16x32xf32>,
    return
  }
  func.func @transform_0(%arg0: i32, %arg1: i32) -> (i32, i32) {
    %c0_i32 = arith.constant 0 : i32
    %c0_i32_0 = arith.constant 0 : i32
    return %arg1, %c0_i32 : i32, i32
  }
  func.func @transform_1(%arg0: i32, %arg1: i32) -> (i32, i32) {
    %c0_i32 = arith.constant 0 : i32
    %c0_i32_0 = arith.constant 0 : i32
    return %arg0, %c0_i32 : i32, i32
  }
  func.func @transform_2(%arg0: i32, %arg1: i32) -> (i32, i32) {
    %c0_i32 = arith.constant 0 : i32
    %c0_i32_0 = arith.constant 0 : i32
    return %c0_i32, %arg0 : i32, i32
  }
  func.func @transform_3(%arg0: i32, %arg1: i32) -> (i32, i32) {
    %c0_i32 = arith.constant 0 : i32
    %c0_i32_0 = arith.constant 0 : i32
    %c0_i32_1 = arith.constant 0 : i32
    return %c0_i32, %c0_i32_0 : i32, i32
  }
  func.func @transform_4(%arg0: i32, %arg1: i32) -> (i32, i32) {
    %c0_i32 = arith.constant 0 : i32
    %c0_i32_0 = arith.constant 0 : i32
    %c0_i32_1 = arith.constant 0 : i32
    return %c0_i32, %c0_i32_0 : i32, i32
  }
  func.func @transform_5(%arg0: i32, %arg1: i32) -> (i32, i32) {
    %c0_i32 = arith.constant 0 : i32
    %c0_i32_0 = arith.constant 0 : i32
    %c0_i32_1 = arith.constant 0 : i32
    return %c0_i32, %c0_i32_0 : i32, i32
  }
  func.func @transform_6(%arg0: i32, %arg1: i32) -> (i32, i32) {
    %c0_i32 = arith.constant 0 : i32
    %c0_i32_0 = arith.constant 0 : i32
    %c0_i32_1 = arith.constant 0 : i32
    return %c0_i32, %c0_i32_0 : i32, i32
  }
  func.func @transform_7(%arg0: i32, %arg1: i32) -> (i32, i32) {
    %c0_i32 = arith.constant 0 : i32
    return %arg1, %arg0 : i32, i32
  }
}

</mosaic_0001>

<bundles_post_ra>
// kernel: tpu_custom_call.1
= control target key start
LH: loop header
LB: loop body
LE: loop exit
PB: predicated region body
PF: predicated region fallthrough
CT: control target
= control target key end

     0   :  { %12 = vsyncpa [#allocation4], 0  ;;  %s447_s0 = inlined_call_operand.hbm [shape: f32[16,32], index: 0, kind: input, shape index: {}]   ;;  %s448_s1 = inlined_call_operand.vmem [shape: f32[32,32], index: 1, kind: input, shape index: {}]   ;;  %s449_s2 = inlined_call_operand.vmem [shape: f32[1,32], index: 2, kind: input, shape index: {}]   ;;  %s450_s3 = inlined_call_operand.vmem [shape: f32[8,32], index: 3, kind: input, shape index: {}]   ;;  %s451_s4 = inlined_call_operand.vmem [shape: f32[1,8], index: 4, kind: input, shape index: {}]   ;;  %s452_s5 = inlined_call_operand.vmem [shape: f32[32,8], index: 5, kind: input, shape index: {}]   ;;  %s453_s6 = inlined_call_operand.vmem [shape: f32[1,32], index: 6, kind: input, shape index: {}]   ;;  %s454_s7 = inlined_call_operand.hbm [shape: f32[16,32], index: 7, kind: output, shape index: {}]  }
   0x1   :  { %13 = vsyncpa [#allocation5], 0  ;;  %s18_s26 = sshll.u32 %s447_s0, 4  ;;  %s326_s27 = smov [#allocation3]   ;;  %s19_s26 = int_to_ptr.hbm [resolvable:$true] %s18_s26 }
   0x2   :  { %s20_s28 = sshll.u32 %s326_s27, 4  ;;  %s327_s29 = smov 128   ;;  %s21_s28 = int_to_ptr.vmem [resolvable:$true] %s20_s28 }
   0x3   :  { %s328_s30 = smov 8  }
   0x4   :  { %26 = dma.hbm_to_vmem [thread:$0]  %s19_s26, 256, %s21_s28, [#allocation4], %s327_s29, %s327_s29, %s328_s30  }
   0x5   :  { %322 = dma.done.wait [#allocation4], 256  }
   0x6   :  { %323 = vsyncadd [#allocation4], 4294967040  ;;  %vm56_vm0 = vcmask 261120   ;;  %vm109_vm1 = vcmask 64512   ;;  %v51_v0 = vld [vmem:[%s450_s3] sm:$0xff]  ;;  %v104_v2 = vld [vmem:[%s452_s5 + $0x18] sm:$0xff] }
   0x7   :  { %244 = vmatpush.xpose.msk.msra.mxu0 %vm56_vm0, %v51_v0  ;;  %v47_v1 = vld [vmem:[%s448_s1] sm:$0xff]  ;;  %249 = vmatpush.xpose.msk.msra.mxu1 %vm109_vm1, %v104_v2  ;;  %v103_v3 = vld [vmem:[%s452_s5 + $0x10] sm:$0xff]  ;;  %v102_v4 = vld [vmem:[%s452_s5 + $0x8] sm:$0xff]  ;;  %s329_s26 = smov [#allocation6]   ;;  %s231_s9 = sshll.u32 %s454_s7, 4  ;;  %s232_s9 = int_to_ptr.hbm [resolvable:$true] %s231_s9 }
   0x8   :  { %263 = vmatpush.xpose.msk.msra.mxu3 %vm109_vm1, %v104_v2  ;;  %v48_v5 = vld [vmem:[%s448_s1 + $0x8] sm:$0xff]  ;;  %v49_v6 = vld [vmem:[%s448_s1 + $0x10] sm:$0xff]  ;;  %v50_v7 = vld [vmem:[%s448_s1 + $0x18] sm:$0xff]  ;;  %s229_s27 = sshll.u32 %s329_s26, 4  ;;  %s230_s27 = int_to_ptr.vmem [resolvable:$true] %s229_s27 }
   0x9   :  { %v101_v8 = vld [vmem:[%s452_s5] sm:$0xff]  ;;  %v172_v36 = vld [vmem:[#allocation3 + $0x8] sm:$0xff] }
   0xa   :  { %245 = vmatmul.msk.f32.vlgmr.msra.gmra.mxu0 %vm56_vm0, %v47_v1  ;;  %v271_v9 = vld [vmem:[%s451_s4] ss:$0 sm:$0xff] }
   0xb   :  { %250 = vmatpush.xpose.msk.msra.mxu1 %vm109_vm1, %v103_v3  ;;  %v272_v18 = vld [vmem:[%s453_s6] ss:$0 sm:$0xff] }
   0xc   :  { %264 = vmatpush.xpose.msk.msra.mxu3 %vm109_vm1, %v103_v3  ;;  %v171_v35 = vld [vmem:[#allocation3] sm:$0xff] }
   0xd   :  { %v273_v37 = vld [vmem:[%s449_s2] ss:$0 sm:$0xff] }
   0xf   :  { %251 = vmatpush.xpose.msk.msra.mxu1 %vm109_vm1, %v102_v4 }
  0x10   :  { %265 = vmatpush.xpose.msk.msra.mxu3 %vm109_vm1, %v102_v4 }
  0x12   :  { %246 = vmatmul.msk.f32.gmra.mxu0 %vm56_vm0, %v48_v5 }
  0x13   :  { %252 = vmatpush.xpose.msk.msra.mxu1 %vm109_vm1, %v101_v8 }
  0x14   :  { %266 = vmatpush.xpose.msk.msra.mxu3 %vm109_vm1, %v101_v8 }
  0x1a   :  { %247 = vmatmul.msk.f32.gmra.mxu0 %vm56_vm0, %v49_v6 }
  0x22   :  { %248 = vmatmul.msk.f32.gmra.mxu0 %vm56_vm0, %v50_v7 }
  0x87   :  { %v89_v10 = vpop.f32.mrf.mxu0 }
  0x88   :  { %v90_v11 = vadd.f32 %v271_v9, %v89_v10 }
  0x8a   :  { %253 = vmatmul.msk.f32.vlgmr.msra.gmra.mxu1 %vm109_vm1, %v90_v11 }
  0x8f   :  { %v92_v12 = vpop.f32.mrf.mxu0 }
  0x90   :  { %v93_v13 = vadd.f32 %v271_v9, %v92_v12 }
  0x92   :  { %254 = vmatmul.msk.f32.vlgmr.msra.gmra.mxu3 %vm109_vm1, %v93_v13 }
  0x97   :  { %v95_v14 = vpop.f32.mrf.mxu0 }
  0x98   :  { %v96_v15 = vadd.f32 %v271_v9, %v95_v14 }
  0x9a   :  { %255 = vmatmul.msk.f32.gmra.mxu3 %vm109_vm1, %v96_v15 }
  0x9f   :  { %v98_v16 = vpop.f32.mrf.mxu0 }
  0xa0   :  { %v99_v17 = vadd.f32 %v271_v9, %v98_v16 }
  0xa2   :  { %256 = vmatmul.msk.f32.gmra.mxu3 %vm109_vm1, %v99_v17 }
 0x107   :  { %v151_v19 = vpop.f32.mrf.mxu1 }
 0x108   :  { %v152_v20 = vadd.f32 %v272_v18, %v151_v19 }
 0x10a   :  { %v163_v21 = vadd.f32 %v152_v20, %v47_v1 }
 0x10c   :  { %167 = vst.msk [vmem:[#allocation2] sm:$0xff] %vm56_vm0, %v163_v21 }
 0x113   :  { %v173_v34 = vld [vmem:[#allocation2] sm:$0xff] }
 0x115   :  { %v154_v22 = vpop.f32.mrf.mxu3 }
 0x116   :  { %v155_v23 = vadd.f32 %v272_v18, %v154_v22 }
 0x118   :  { %v164_v24 = vadd.f32 %v155_v23, %v48_v5 }
 0x11a   :  { %168 = vst.msk [vmem:[#allocation2 + $0x8] sm:$0xff] %vm56_vm0, %v164_v24 }
 0x11d   :  { %v157_v25 = vpop.f32.mrf.mxu3 }
 0x11e   :  { %v158_v26 = vadd.f32 %v272_v18, %v157_v25 }
 0x120   :  { %v165_v27 = vadd.f32 %v158_v26, %v49_v6 }
 0x121   :  { %v174_v33 = vld [vmem:[#allocation2 + $0x8] sm:$0xff] }
 0x122   :  { %169 = vst.msk [vmem:[#allocation2 + $0x10] sm:$0xff] %vm56_vm0, %v165_v27 }
 0x125   :  { %v160_v28 = vpop.f32.mrf.mxu3 }
 0x126   :  { %v161_v29 = vadd.f32 %v272_v18, %v160_v28 }
 0x128   :  { %v166_v30 = vadd.f32 %v161_v29, %v50_v7 }
 0x129   :  { %v175_v32 = vld [vmem:[#allocation2 + $0x10] sm:$0xff] }
 0x12a   :  { %170 = vst.msk [vmem:[#allocation2 + $0x18] sm:$0xff] %vm56_vm0, %v166_v30 }
 0x131   :  { %v176_v31 = vld [vmem:[#allocation2 + $0x18] sm:$0xff] }
 0x132   :  { %257 = vmatpush.xpose.msk.msra.mxu2 %vm56_vm0, %v176_v31 }
 0x136   :  { %258 = vmatpush.xpose.msk.msra.mxu2 %vm56_vm0, %v175_v32 }
 0x13a   :  { %259 = vmatpush.xpose.msk.msra.mxu2 %vm56_vm0, %v174_v33 }
 0x13e   :  { %260 = vmatpush.xpose.msk.msra.mxu2 %vm56_vm0, %v173_v34 }
 0x141   :  { %261 = vmatmul.msk.f32.vlgmr.msra.gmra.mxu2 %vm56_vm0, %v171_v35 }
 0x149   :  { %262 = vmatmul.msk.f32.gmra.mxu2 %vm56_vm0, %v172_v36 }
 0x1c4   :  { %v217_v38 = vpop.f32.mrf.mxu2 }
 0x1c5   :  { %v218_v39 = vadd.f32 %v273_v37, %v217_v38 }
 0x1c7   :  { %223 = vst.msk [vmem:[#allocation6] sm:$0xff] %vm56_vm0, %v218_v39 }
 0x1cc   :  { %v220_v40 = vpop.f32.mrf.mxu2 }
 0x1cd   :  { %v221_v41 = vadd.f32 %v273_v37, %v220_v40 }
 0x1cf   :  { %224 = vst.msk [vmem:[#allocation6 + $0x8] sm:$0xff] %vm56_vm0, %v221_v41 }
 0x1d0   :  { %237 = dma.vmem_to_hbm [thread:$0]  %s230_s27, 256, %s232_s9, [#allocation5], %s327_s29, %s327_s29, %s328_s30  }
 0x1d1   :  { %324 = dma.done.wait [#allocation5], 256  }
 0x1d2   :  { %325 = vsyncadd [#allocation5], 4294967040 }
 0x1d3   :  { %242 = vsyncpa [#allocation4], 1 }
 0x1d4   :  { %243 = vsyncpa [#allocation5], 1 }

</bundles_post_ra>
